<compile_context>
chip_gen: v6e
topology: v6e:2x2x1
jax: 0.10.0
libtpu: 0.0.40
codegen_flags: <defaults>
</compile_context>

<pallas_src>
import jax
import jax.numpy as jnp
from jax.experimental import pallas as pl
from jax.experimental.pallas import tpu as pltpu

_SOBEL_EPS = 1e-6  # kornia.filters.sobel default


def _sobel_magnitude(x):
    """Separable Sobel gradient magnitude with replicate boundary.

    x: (P, H, W) block of planes. Returns sqrt(gx^2 + gy^2 + 1e-6), matching
    kornia.filters.sobel(normalized=False, eps=1e-6) (sign of gx/gy irrelevant
    for the magnitude).
    """
    # Horizontal (lane axis) 1-D passes with edge clamp.
    x_l = jnp.concatenate([x[..., :1], x[..., :-1]], axis=-1)   # x(i, j-1)
    x_r = jnp.concatenate([x[..., 1:], x[..., -1:]], axis=-1)   # x(i, j+1)
    t1 = x_l + 2.0 * x + x_r        # smoothing along W
    t2 = x_r - x_l                  # derivative along W

    # Vertical (sublane axis) 1-D passes with edge clamp.
    t1_u = jnp.concatenate([t1[:, :1, :], t1[:, :-1, :]], axis=-2)   # row i-1
    t1_d = jnp.concatenate([t1[:, 1:, :], t1[:, -1:, :]], axis=-2)   # row i+1
    t2_u = jnp.concatenate([t2[:, :1, :], t2[:, :-1, :]], axis=-2)
    t2_d = jnp.concatenate([t2[:, 1:, :], t2[:, -1:, :]], axis=-2)

    gx = t2_u + 2.0 * t2 + t2_d     # smoothing along H of the W-derivative
    gy = t1_d - t1_u                # derivative along H of the W-smoothing
    return jnp.sqrt(gx * gx + gy * gy + _SOBEL_EPS)


def _sobel_max_kernel(x_ref, pmax_ref):
    """Per-grid-step partial max of the Sobel magnitude.

    x_ref   : (P, H, W)   input planes            (VMEM)
    pmax_ref: (1, 8, 128) partial-max output tile (VMEM), scalar broadcast
    """
    grad = _sobel_magnitude(x_ref[...])
    m = jnp.max(grad)
    pmax_ref[...] = jnp.full(pmax_ref.shape, m, dtype=pmax_ref.dtype)


def _threshold_kernel(thresh_ref, x_ref, out_ref):
    """Recompute Sobel and emit (grad > gmax * eps) as float32.

    thresh_ref: (1,) scalar threshold = global_max * eps  (SMEM)
    x_ref     : (P, H, W) input planes                    (VMEM)
    out_ref   : (P, H, W) binary output                   (VMEM)
    """
    grad = _sobel_magnitude(x_ref[...])
    out_ref[...] = (grad > thresh_ref[0]).astype(out_ref.dtype)


def _planes_per_block(n_planes, plane_bytes, budget_bytes=2 << 20):
    """Largest divisor of n_planes whose input block stays under the budget."""
    best = 1
    for d in range(n_planes, 0, -1):
        if n_planes % d == 0 and d * plane_bytes <= budget_bytes:
            best = d
            break
    return best


def boundary_aware_prior_pallas(image: jax.Array, eps: float = 0.05) -> jax.Array:
    """Equivalent of BoundaryAwarePrior().forward(image) for NCHW float input.

    In the PyTorch module, `forward` passes `self.normalized` into the
    `as_gradient` slot, so with defaults the effective path is:
      sobel (normalized=False, eps=1e-6) -> / global_max -> (> eps).float()
    """
    B, C, H, W = image.shape
    N = B * C
    x = image.reshape(N, H, W).astype(jnp.float32)

    plane_bytes = H * W * 4
    # TODO(synk): row-tile (with a 1-row halo) planes larger than the VMEM
    # budget instead of falling back to whole-plane blocks.
    P = _planes_per_block(N, plane_bytes)
    G = N // P

    compiler_params = pltpu.CompilerParams(
        dimension_semantics=("parallel",),   # every grid step is independent
        vmem_limit_bytes=32 << 20,
    )

    # Pass 1: per-block partial max of the Sobel magnitude (no grad in HBM).
    pmax = pl.pallas_call(
        _sobel_max_kernel,
        out_shape=jax.ShapeDtypeStruct((G, 8, 128), jnp.float32),
        grid=(G,),
        in_specs=[pl.BlockSpec((P, H, W), lambda i: (i, 0, 0))],
        out_specs=pl.BlockSpec((1, 8, 128), lambda i: (i, 0, 0)),
        compiler_params=compiler_params,
    )(x)

    # Tiny final reduction + threshold hoist in plain JAX.
    thresh = (jnp.max(pmax) * jnp.float32(eps)).reshape(1)

    # Pass 2: recompute Sobel, compare against the scalar, write binary output.
    boundary = pl.pallas_call(
        _threshold_kernel,
        out_shape=jax.ShapeDtypeStruct((N, H, W), jnp.float32),
        grid=(G,),
        in_specs=[
            pl.BlockSpec(memory_space=pltpu.SMEM),          # scalar threshold
            pl.BlockSpec((P, H, W), lambda i: (i, 0, 0)),
        ],
        out_specs=pl.BlockSpec((P, H, W), lambda i: (i, 0, 0)),
        compiler_params=compiler_params,
    )(thresh, x)

    return boundary.reshape(B, C, H, W)


if __name__ == "__main__":
    key = jax.random.PRNGKey(0)
    # [B, C, H, W] image with values in [0, 1], like the PyTorch module expects.
    image = jax.random.uniform(key, (2, 4, 16, 16), dtype=jnp.float32)

    out = boundary_aware_prior_pallas(image, eps=0.05)
    out = jax.block_until_ready(out)

    assert out.shape == image.shape
    assert out.dtype == jnp.float32
    assert bool(jnp.all((out == 0.0) | (out == 1.0)))  # binary mask

    # Pure-JAX reference: direct 3x3 cross-correlation on an edge-padded image.
    def _reference(img, eps):
        b, c, h, w = img.shape
        xr = img.reshape(b * c, h, w).astype(jnp.float32)
        xp = jnp.pad(xr, ((0, 0), (1, 1), (1, 1)), mode="edge")
        x00 = xp[:, 0:h, 0:w]
        x01 = xp[:, 0:h, 1:w + 1]
        x02 = xp[:, 0:h, 2:w + 2]
        x10 = xp[:, 1:h + 1, 0:w]
        x12 = xp[:, 1:h + 1, 2:w + 2]
        x20 = xp[:, 2:h + 2, 0:w]
        x21 = xp[:, 2:h + 2, 1:w + 1]
        x22 = xp[:, 2:h + 2, 2:w + 2]
        gx = (-x00 + x02) + 2.0 * (-x10 + x12) + (-x20 + x22)
        gy = (-x00 - 2.0 * x01 - x02) + (x20 + 2.0 * x21 + x22)
        grad = jnp.sqrt(gx * gx + gy * gy + 1e-6)
        bd = (grad / jnp.max(grad) > eps).astype(jnp.float32)
        return bd.reshape(b, c, h, w)

    ref = _reference(image, 0.05)
    mismatch = float(jnp.mean(jnp.abs(out - ref)))
    assert mismatch < 1e-3, f"mismatch fraction {mismatch}"

    print("KERNEL_OK")
</pallas_src>

<mosaic_0001>
module attributes {stable_mosaic.version = 11 : i64} {
  func.func @_sobel_max_kernel(%arg0: i32, %arg1: memref<8x16x16xf32, #tpu.memory_space<vmem>>, %arg2: memref<1x8x128xf32, #tpu.memory_space<vmem>>) attributes {dimension_semantics = [#tpu.dimension_semantics<parallel>], iteration_bounds = array<i64: 1>, scalar_prefetch = 0 : i64, scratch_operands = 0 : i64, tpu.core_type = #tpu.core_type<tc>, window_params = [{transform_indices = @transform_0, window_bounds = array<i64: 8, 16, 16>}, {transform_indices = @transform_1, window_bounds = array<i64: 1, 8, 128>}]} {
    %c0 = arith.constant 0 : index
    %c0_0 = arith.constant 0 : index
    %c0_1 = arith.constant 0 : index
    %0 = vector.load %arg1[%c0, %c0_0, %c0_1] : memref<8x16x16xf32, #tpu.memory_space<vmem>>, vector<8x16x16xf32>
    %1 = vector.extract_strided_slice %0 {offsets = [0, 0, 0], sizes = [8, 16, 1], strides = [1, 1, 1]} : vector<8x16x16xf32> to vector<8x16x1xf32>
    %2 = vector.extract_strided_slice %0 {offsets = [0, 0, 0], sizes = [8, 16, 15], strides = [1, 1, 1]} : vector<8x16x16xf32> to vector<8x16x15xf32>
    %3 = tpu.concatenate %1, %2 in 2 : vector<8x16x1xf32>, vector<8x16x15xf32> -> vector<8x16x16xf32>
    %4 = vector.extract_strided_slice %0 {offsets = [0, 0, 1], sizes = [8, 16, 15], strides = [1, 1, 1]} : vector<8x16x16xf32> to vector<8x16x15xf32>
    %5 = vector.extract_strided_slice %0 {offsets = [0, 0, 15], sizes = [8, 16, 1], strides = [1, 1, 1]} : vector<8x16x16xf32> to vector<8x16x1xf32>
    %6 = tpu.concatenate %4, %5 in 2 : vector<8x16x15xf32>, vector<8x16x1xf32> -> vector<8x16x16xf32>
    %cst = arith.constant 2.000000e+00 : f32
    %7 = vector.broadcast %cst : f32 to vector<8x16x16xf32>
    %8 = arith.mulf %7, %0 : vector<8x16x16xf32>
    %9 = arith.addf %3, %8 : vector<8x16x16xf32>
    %10 = arith.addf %9, %6 : vector<8x16x16xf32>
    %11 = arith.subf %6, %3 : vector<8x16x16xf32>
    %12 = vector.extract_strided_slice %10 {offsets = [0, 0, 0], sizes = [8, 1, 16], strides = [1, 1, 1]} : vector<8x16x16xf32> to vector<8x1x16xf32>
    %13 = vector.extract_strided_slice %10 {offsets = [0, 0, 0], sizes = [8, 15, 16], strides = [1, 1, 1]} : vector<8x16x16xf32> to vector<8x15x16xf32>
    %14 = tpu.concatenate %12, %13 in 1 : vector<8x1x16xf32>, vector<8x15x16xf32> -> vector<8x16x16xf32>
    %15 = vector.extract_strided_slice %10 {offsets = [0, 1, 0], sizes = [8, 15, 16], strides = [1, 1, 1]} : vector<8x16x16xf32> to vector<8x15x16xf32>
    %16 = vector.extract_strided_slice %10 {offsets = [0, 15, 0], sizes = [8, 1, 16], strides = [1, 1, 1]} : vector<8x16x16xf32> to vector<8x1x16xf32>
    %17 = tpu.concatenate %15, %16 in 1 : vector<8x15x16xf32>, vector<8x1x16xf32> -> vector<8x16x16xf32>
    %18 = vector.extract_strided_slice %11 {offsets = [0, 0, 0], sizes = [8, 1, 16], strides = [1, 1, 1]} : vector<8x16x16xf32> to vector<8x1x16xf32>
    %19 = vector.extract_strided_slice %11 {offsets = [0, 0, 0], sizes = [8, 15, 16], strides = [1, 1, 1]} : vector<8x16x16xf32> to vector<8x15x16xf32>
    %20 = tpu.concatenate %18, %19 in 1 : vector<8x1x16xf32>, vector<8x15x16xf32> -> vector<8x16x16xf32>
    %21 = vector.extract_strided_slice %11 {offsets = [0, 1, 0], sizes = [8, 15, 16], strides = [1, 1, 1]} : vector<8x16x16xf32> to vector<8x15x16xf32>
    %22 = vector.extract_strided_slice %11 {offsets = [0, 15, 0], sizes = [8, 1, 16], strides = [1, 1, 1]} : vector<8x16x16xf32> to vector<8x1x16xf32>
    %23 = tpu.concatenate %21, %22 in 1 : vector<8x15x16xf32>, vector<8x1x16xf32> -> vector<8x16x16xf32>
    %cst_2 = arith.constant 2.000000e+00 : f32
    %24 = vector.broadcast %cst_2 : f32 to vector<8x16x16xf32>
    %25 = arith.mulf %24, %11 : vector<8x16x16xf32>
    %26 = arith.addf %20, %25 : vector<8x16x16xf32>
    %27 = arith.addf %26, %23 : vector<8x16x16xf32>
    %28 = arith.subf %17, %14 : vector<8x16x16xf32>
    %29 = arith.mulf %27, %27 : vector<8x16x16xf32>
    %30 = arith.mulf %28, %28 : vector<8x16x16xf32>
    %31 = arith.addf %29, %30 : vector<8x16x16xf32>
    %cst_3 = arith.constant 9.99999997E-7 : f32
    %32 = vector.broadcast %cst_3 : f32 to vector<8x16x16xf32>
    %33 = arith.addf %31, %32 : vector<8x16x16xf32>
    %34 = math.sqrt %33 : vector<8x16x16xf32>
    %35 = vector.shape_cast %34 : vector<8x16x16xf32> to vector<1x8x16x16xf32>
    %cst_4 = arith.constant dense<0xFF800000> : vector<1xf32>
    %36 = vector.multi_reduction <maximumf>, %35, %cst_4 [1, 2, 3] : vector<1x8x16x16xf32> to vector<1xf32>
    %37 = vector.shape_cast %36 : vector<1xf32> to vector<1x1x1x1xf32>
    %38 = vector.extract %37[0, 0, 0, 0] : f32 from vector<1x1x1x1xf32>
    %39 = vector.broadcast %38 : f32 to vector<1x8x128xf32>
    %c0_5 = arith.constant 0 : index
    %c0_6 = arith.constant 0 : index
    %c0_7 = arith.constant 0 : index
    %40 = vector.load %arg2[%c0_5, %c0_6, %c0_7] : memref<1x8x128xf32, #tpu.memory_space<vmem>>, vector<1x8x128xf32>
    tpu.vector_store %arg2[%c0_5, %c0_6, %c0_7], %39 {strides = array<i32>} : memref<1x8x128xf32, #tpu.memory_space<vmem>>, vector<1x8x128xf32>,
    return
  }
  func.func @transform_0(%arg0: i32) -> (i32, i32, i32) {
    %c0_i32 = arith.constant 0 : i32
    %c0_i32_0 = arith.constant 0 : i32
    %c0_i32_1 = arith.constant 0 : i32
    return %arg0, %c0_i32, %c0_i32_0 : i32, i32, i32
  }
  func.func @transform_1(%arg0: i32) -> (i32, i32, i32) {
    %c0_i32 = arith.constant 0 : i32
    %c0_i32_0 = arith.constant 0 : i32
    %c0_i32_1 = arith.constant 0 : i32
    return %arg0, %c0_i32, %c0_i32_0 : i32, i32, i32
  }
}

</mosaic_0001>

<bundles_post_ra>
// kernel: tpu_custom_call.1
= control target key start
LH: loop header
LB: loop body
LE: loop exit
PB: predicated region body
PF: predicated region fallthrough
CT: control target
= control target key end

     0   :  { %6 = vsyncpa [#allocation3], 0  ;;  %s1424_s0 = inlined_call_operand.hbm [shape: f32[8,16,16], index: 0, kind: input, shape index: {}]   ;;  %s1425_s1 = inlined_call_operand.hbm [shape: f32[1,8,128], index: 1, kind: output, shape index: {}]  }
   0x1   :  { %7 = vsyncpa [#allocation4], 0  ;;  %s857_s6 = smov [#allocation2]  }
   0x2   :  { %s13_s7 = sshll.u32 %s857_s6, 4  ;;  %s14_s7 = int_to_ptr.vmem [resolvable:$true] %s13_s7 }
   0x3   :  { %s821_s8 = scalar_lea.vmem %s14_s7, 2048  ;;  %p826_p1 = scmp.lt.s32.totalorder %s14_s7, %s14_s7 }
   0x4   :  { %p822_p0 = scmp.ne.s32.totalorder %s14_s7, %s821_s8  ;;  %p827_p2 = scmp.lt.s32.totalorder %s821_s8, %s821_s8 }
   0x6   :  { %p828_p3 = por %p827_p2, %p826_p1 }
   0x8   :  { %p829_p4 = pnand %p828_p3, %p822_p0 }
   0xa   :  { %832 = shalt.err (!%p829_p4)
}
   0xb   :  { %s858_s9 = smov 128   ;;  %s859_s10 = smov 8  }
   0xc   :  { %19 = dma.hbm_to_vmem [thread:$0]  %s1424_s0, 2048, %s14_s7, [#allocation3], %s858_s9, %s858_s9, %s859_s10  }
   0xd   :  { %853 = dma.done.wait [#allocation3], 2048  }
   0xe   :  { %854 = vsyncadd [#allocation3], 4294965248  ;;  %v876_v0 = vld [vmem:[#allocation2 + $0x10] sm:$0xff]  ;;  %v878_v1 = vld [vmem:[#allocation2] sm:$0xff]  ;;  %s860_s13 = smov 1   ;;  %s861_s0 = smov 127  }
   0xf   :  { %59 = vrot.lane.b32.xlu1 %v876_v0, %s860_s13  ;;  %55 = vrot.lane.b32.xlu0 %v878_v1, %s860_s13  ;;  %v884_v2 = vld [vmem:[#allocation2 + $0x18] sm:$0xff]  ;;  %v886_v3 = vld [vmem:[#allocation2 + $0x8] sm:$0xff]  ;;  %v894_v5 = vld [vmem:[#allocation2 + $0x20] sm:$0xff]  ;;  %vm103_vm0 = vcmask 7168   ;;  %v185_v22 = vmul.f32 2.0, %v878_v1  ;;  %vm168_vm1 = vcmask 121856  }
  0x10   :  { %v892_v4 = vld [vmem:[#allocation2 + $0x28] sm:$0xff]  ;;  %v900_v6 = vld [vmem:[#allocation2 + $0x38] sm:$0xff]  ;;  %v902_v7 = vld [vmem:[#allocation2 + $0x30] sm:$0xff]  ;;  %v186_v26 = vmul.f32 2.0, %v886_v3  ;;  %v187_v34 = vmul.f32 2.0, %v876_v0  ;;  %v188_v38 = vmul.f32 2.0, %v884_v2 }
  0x11   :  { %v924_v8 = vld [vmem:[#allocation2 + $0x48] sm:$0xff]  ;;  %v926_v9 = vld [vmem:[#allocation2 + $0x40] sm:$0xff]  ;;  %v932_v10 = vld [vmem:[#allocation2 + $0x58] sm:$0xff]  ;;  %v993_v39 = vmul.f32 2.0, %v892_v4  ;;  %v996_v40 = vmul.f32 2.0, %v894_v5  ;;  %v999_v42 = vmul.f32 2.0, %v900_v6 }
  0x12   :  { %v934_v11 = vld [vmem:[#allocation2 + $0x50] sm:$0xff]  ;;  %v948_v12 = vld [vmem:[#allocation2 + $0x68] sm:$0xff]  ;;  %v950_v13 = vld [vmem:[#allocation2 + $0x60] sm:$0xff]  ;;  %v1002_v43 = vmul.f32 2.0, %v902_v7  ;;  %vm265_vm2 = vcmask 1040384   ;;  %vm314_vm3 = vcmask 1046528  }
  0x13   :  { %61 = vrot.lane.b32.xlu1 %v884_v2, %s860_s13  ;;  %57 = vrot.lane.b32.xlu0 %v886_v3, %s860_s13  ;;  %v956_v14 = vld [vmem:[#allocation2 + $0x78] sm:$0xff]  ;;  %v958_v15 = vld [vmem:[#allocation2 + $0x70] sm:$0xff]  ;;  %v1007_v47 = vmul.f32 2.0, %v924_v8  ;;  %v1012_v53 = vmul.f32 2.0, %v926_v9  ;;  %v1017_v61 = vmul.f32 2.0, %v932_v10  ;;  %s862_s14 = smov [#allocation5]  }
  0x14   :  { %s764_s15 = sshll.u32 %s862_s14, 4  ;;  %s765_s15 = int_to_ptr.vmem [resolvable:$true] %s764_s15 }
  0x15   :  { %s833_s17 = scalar_lea.vmem %s765_s15, 128  ;;  %p838_p6 = scmp.lt.s32.totalorder %s765_s15, %s765_s15 }
  0x16   :  { %p834_p5 = scmp.ne.s32.totalorder %s765_s15, %s833_s17  ;;  %p839_p7 = scmp.lt.s32.totalorder %s833_s17, %s833_s17 }
  0x17   :  { %65 = vrot.lane.b32.xlu1 %v892_v4, %s860_s13  ;;  %63 = vrot.lane.b32.xlu0 %v894_v5, %s860_s13 }
  0x18   :  { %p840_p8 = por %p839_p7, %p838_p6 }
  0x1a   :  { %p841_p9 = pnand %p840_p8, %p834_p5 }
  0x1b   :  { %69 = vrot.lane.b32.xlu1 %v900_v6, %s860_s13  ;;  %67 = vrot.lane.b32.xlu0 %v902_v7, %s860_s13 }
  0x1f   :  { %122 = vrot.lane.b32.xlu1 %v886_v3, %s861_s0  ;;  %120 = vrot.lane.b32.xlu0 %v878_v1, %s861_s0 }
  0x23   :  { %126 = vrot.lane.b32.xlu1 %v884_v2, %s861_s0  ;;  %124 = vrot.lane.b32.xlu0 %v876_v0, %s861_s0 }
  0x27   :  { %130 = vrot.lane.b32.xlu1 %v892_v4, %s861_s0  ;;  %128 = vrot.lane.b32.xlu0 %v894_v5, %s861_s0 }
  0x2b   :  { %134 = vrot.lane.b32.xlu1 %v900_v6, %s861_s0  ;;  %132 = vrot.lane.b32.xlu0 %v902_v7, %s861_s0 }
  0x2f   :  { %73 = vrot.lane.b32.xlu1 %v924_v8, %s860_s13  ;;  %71 = vrot.lane.b32.xlu0 %v926_v9, %s860_s13 }
  0x33   :  { %77 = vrot.lane.b32.xlu1 %v932_v10, %s860_s13  ;;  %75 = vrot.lane.b32.xlu0 %v934_v11, %s860_s13 }
  0x37   :  { %138 = vrot.lane.b32.xlu1 %v924_v8, %s861_s0  ;;  %136 = vrot.lane.b32.xlu0 %v926_v9, %s861_s0 }
  0x3b   :  { %142 = vrot.lane.b32.xlu1 %v932_v10, %s861_s0  ;;  %140 = vrot.lane.b32.xlu0 %v934_v11, %s861_s0 }
  0x3f   :  { %81 = vrot.lane.b32.xlu1 %v948_v12, %s860_s13  ;;  %79 = vrot.lane.b32.xlu0 %v950_v13, %s860_s13 }
  0x43   :  { %85 = vrot.lane.b32.xlu1 %v956_v14, %s860_s13  ;;  %83 = vrot.lane.b32.xlu0 %v958_v15, %s860_s13 }
  0x47   :  { %146 = vrot.lane.b32.xlu1 %v948_v12, %s861_s0  ;;  %144 = vrot.lane.b32.xlu0 %v950_v13, %s861_s0 }
  0x4b   :  { %150 = vrot.lane.b32.xlu1 %v956_v14, %s861_s0  ;;  %148 = vrot.lane.b32.xlu0 %v958_v15, %s861_s0 }
  0x81   :  { %v60_v16 = vpop.permute.xlu1 %59  ;;  %v56_v17 = vpop.permute.xlu0 %55 }
  0x82   :  { %v104_v25 = vsel %vm103_vm0, %v878_v1, %v56_v17  ;;  %v106_v45 = vsel %vm103_vm0, %v876_v0, %v60_v16 }
  0x83   :  { %v201_v28 = vadd.f32 %v185_v22, %v104_v25  ;;  %v203_v58 = vadd.f32 %v187_v34, %v106_v45 }
  0x85   :  { %v62_v18 = vpop.permute.xlu1 %61  ;;  %v58_v19 = vpop.permute.xlu0 %57 }
  0x86   :  { %v105_v27 = vsel %vm103_vm0, %v886_v3, %v58_v19  ;;  %v107_v48 = vsel %vm103_vm0, %v884_v2, %v62_v18 }
  0x87   :  { %v202_v31 = vadd.f32 %v186_v26, %v105_v27  ;;  %v204_v62 = vadd.f32 %v188_v38, %v107_v48 }
  0x89   :  { %v972_v20 = vpop.permute.xlu1 %65  ;;  %v974_v21 = vpop.permute.xlu0 %63 }
  0x8d   :  { %v977_v23 = vpop.permute.xlu1 %69  ;;  %v979_v24 = vpop.permute.xlu0 %67 }
  0x91   :  { %v123_v29 = vpop.permute.xlu1 %122  ;;  %v121_v30 = vpop.permute.xlu0 %120 }
  0x92   :  { %v170_v32 = vsel %vm168_vm1, %v123_v29, %v886_v3  ;;  %v169_v33 = vsel %vm168_vm1, %v121_v30, %v878_v1 }
  0x93   :  { %v234_v35 = vsub.f32 %v170_v32, %v105_v27  ;;  %v217_v36 = vadd.f32 %v201_v28, %v169_v33  ;;  %v233_v37 = vsub.f32 %v169_v33, %v104_v25  ;;  %v218_v41 = vadd.f32 %v202_v31, %v170_v32 }
  0x94   :  { %v108_v32 = vsel %vm103_vm0, %v894_v5, %v974_v21 }
  0x95   :  { %v380_v44 = vrot.slane %v234_v35, 7  ;;  %v379_v46 = vrot.slane %v233_v37, 7  ;;  %v476_v49 = vmul.f32 2.0, %v234_v35  ;;  %v266_v50 = vrot.slane %v217_v36, 7  ;;  %v127_v51 = vpop.permute.xlu1 %126  ;;  %v125_v52 = vpop.permute.xlu0 %124 }
  0x96   :  { %v316_v54 = vrot.slane %v218_v41, 1  ;;  %v315_v55 = vrot.slane %v217_v36, 1  ;;  %v475_v57 = vmul.f32 2.0, %v233_v37  ;;  %v267_v59 = vrot.slane %v218_v41, 7 }
  0x97   :  { %v381_v56 = vsel %vm265_vm2, %v379_v46, %v380_v44  ;;  %v419_v60 = vsel %vm265_vm2, %v233_v37, %v379_v46  ;;  %v428_v63 = vrot.slane %v234_v35, 1  ;;  %v172_v1 = vsel %vm168_vm1, %v127_v51, %v884_v2 }
  0x98   :  { %v171_v3 = vsel %vm168_vm1, %v125_v52, %v876_v0  ;;  %v306_v16 = vsel %vm265_vm2, %v217_v36, %v266_v50  ;;  %v427_v17 = vrot.slane %v233_v37, 1  ;;  %v492_v18 = vadd.f32 %v476_v49, %v381_v56 }
  0x99   :  { %v236_v19 = vsub.f32 %v172_v1, %v107_v48  ;;  %v317_v22 = vsel %vm314_vm3, %v315_v55, %v316_v54  ;;  %v491_v25 = vadd.f32 %v475_v57, %v419_v60  ;;  %v220_v26 = vadd.f32 %v204_v62, %v172_v1  ;;  %v131_v31 = vpop.permute.xlu1 %130  ;;  %v129_v36 = vpop.permute.xlu0 %128 }
  0x9a   :  { %v235_v27 = vsub.f32 %v171_v3, %v106_v45  ;;  %v355_v28 = vsel %vm314_vm3, %v316_v54, %v218_v41  ;;  %v268_v29 = vsel %vm265_vm2, %v266_v50, %v267_v59  ;;  %v219_v30 = vadd.f32 %v203_v58, %v171_v3 }
  0x9b   :  { %v1028_v2 = vmul.f32 2.0, %v934_v11  ;;  %v109_v0 = vsel %vm103_vm0, %v892_v4, %v972_v20  ;;  %v467_v33 = vsel %vm314_vm3, %v428_v63, %v234_v35  ;;  %v383_v34 = vrot.slane %v236_v19, 7 }
  0x9c   :  { %v429_v37 = vsel %vm314_vm3, %v427_v17, %v428_v63  ;;  %v508_v38 = vadd.f32 %v492_v18, %v467_v33  ;;  %v523_v41 = vsub.f32 %v317_v22, %v306_v16  ;;  %v382_v44 = vrot.slane %v235_v27, 7 }
  0x9d   :  { %v507_v45 = vadd.f32 %v491_v25, %v429_v37  ;;  %v524_v46 = vsub.f32 %v355_v28, %v268_v29  ;;  %v270_v48 = vrot.slane %v220_v26, 7  ;;  %v319_v49 = vrot.slane %v220_v26, 1  ;;  %v135_v59 = vpop.permute.xlu1 %134  ;;  %v133_v16 = vpop.permute.xlu0 %132 }
  0x9e   :  { %v478_v50 = vmul.f32 2.0, %v236_v19  ;;  %v269_v51 = vrot.slane %v219_v30, 7  ;;  %v318_v20 = vrot.slane %v219_v30, 1  ;;  %v420_v52 = vsel %vm265_vm2, %v235_v27, %v382_v44 }
  0x9f   :  { %v431_v54 = vrot.slane %v236_v19, 1  ;;  %v384_v21 = vsel %vm265_vm2, %v382_v44, %v383_v34  ;;  %v430_v35 = vrot.slane %v235_v27, 1  ;;  %v477_v55 = vmul.f32 2.0, %v235_v27 }
  0xa0   :  { %v206_v56 = vadd.f32 %v993_v39, %v109_v0  ;;  %v205_v57 = vadd.f32 %v996_v40, %v108_v32  ;;  %v540_v58 = vmul.f32 %v508_v38, %v508_v38  ;;  %v1043_v60 = vmul.f32 2.0, %v948_v12 }
  0xa1   :  { %v539_v62 = vmul.f32 %v507_v45, %v507_v45  ;;  %v493_v63 = vadd.f32 %v477_v55, %v420_v52  ;;  %v174_v1 = vsel %vm168_vm1, %v131_v31, %v892_v4  ;;  %v173_v3 = vsel %vm168_vm1, %v129_v36, %v894_v5 }
  0xa2   :  { %v555_v17 = vmul.f32 %v523_v41, %v523_v41  ;;  %v307_v18 = vsel %vm265_vm2, %v219_v30, %v269_v51  ;;  %v320_v39 = vsel %vm314_vm3, %v318_v20, %v319_v49  ;;  %v494_v40 = vadd.f32 %v478_v50, %v384_v21  ;;  %v1065_v41 = vpop.permute.xlu1 %73 }
  0xa3   :  { %v556_v22 = vmul.f32 %v524_v46, %v524_v46  ;;  %v356_v25 = vsel %vm314_vm3, %v319_v49, %v220_v26  ;;  %v271_v27 = vsel %vm265_vm2, %v269_v51, %v270_v48  ;;  %v432_v28 = vsel %vm314_vm3, %v430_v35, %v431_v54 }
  0xa4   :  { %v111_v4 = vsel %vm103_vm0, %v900_v6, %v977_v23  ;;  %v509_v29 = vadd.f32 %v493_v63, %v432_v28  ;;  %v1057_v5 = vsub.f32 %v174_v1, %v109_v0  ;;  %v1059_v31 = vsub.f32 %v173_v3, %v108_v32  ;;  %v1070_v32 = vpop.permute.xlu0 %71 }
  0xa5   :  { %v571_v30 = vadd.f32 %v555_v17, %v539_v62  ;;  %v572_v33 = vadd.f32 %v556_v22, %v540_v58  ;;  %v468_v34 = vsel %vm314_vm3, %v431_v54, %v236_v19  ;;  %v525_v36 = vsub.f32 %v320_v39, %v307_v18 }
  0xa6   :  { %v110_v26 = vsel %vm103_vm0, %v902_v7, %v979_v24  ;;  %v510_v37 = vadd.f32 %v494_v40, %v468_v34  ;;  %v526_v38 = vsub.f32 %v356_v25, %v271_v27  ;;  %v1068_v23 = vmul.f32 2.0, %v950_v13 }
  0xa7   :  { %v222_v0 = vadd.f32 %v206_v56, %v174_v1  ;;  %v221_v44 = vadd.f32 %v205_v57, %v173_v3  ;;  %v1073_v45 = vmul.f32 2.0, %v956_v14  ;;  %v1076_v19 = vmul.f32 2.0, %v958_v15  ;;  %v1093_v3 = vpop.permute.xlu1 %77 }
  0xa8   :  { %v208_v46 = vadd.f32 %v999_v42, %v111_v4  ;;  %v541_v24 = vmul.f32 %v509_v29, %v509_v29  ;;  %v386_v48 = vrot.slane %v1057_v5, 7  ;;  %v385_v49 = vrot.slane %v1059_v31, 7 }
  0xa9   :  { %v207_v50 = vadd.f32 %v1002_v43, %v110_v26  ;;  %v1082_v51 = vadd.f32 1e-06, %v571_v30  ;;  %v1084_v20 = vadd.f32 1e-06, %v572_v33  ;;  %v557_v52 = vmul.f32 %v525_v36, %v525_v36 }
  0xaa   :  { %v542_v54 = vmul.f32 %v510_v37, %v510_v37  ;;  %v558_v21 = vmul.f32 %v526_v38, %v526_v38  ;;  %v176_v35 = vsel %vm168_vm1, %v135_v59, %v900_v6  ;;  %v175_v42 = vsel %vm168_vm1, %v133_v16, %v902_v7  ;;  %v76_v16 = vpop.permute.xlu0 %75 }
  0xab   :  { %v273_v55 = vrot.slane %v222_v0, 7  ;;  %v322_v56 = vrot.slane %v222_v0, 1  ;;  %v480_v57 = vmul.f32 2.0, %v1057_v5  ;;  %v272_v58 = vrot.slane %v221_v44, 7 }
  0xac   :  { %v573_v62 = vadd.f32 %v557_v52, %v541_v24  ;;  %v321_v43 = vrot.slane %v221_v44, 1  ;;  %v387_v63 = vsel %vm265_vm2, %v385_v49, %v386_v48  ;;  %v479_v1 = vmul.f32 2.0, %v1059_v31 }
  0xad   :  { %v421_v17 = vsel %vm265_vm2, %v1059_v31, %v385_v49  ;;  %v224_v6 = vadd.f32 %v208_v46, %v176_v35  ;;  %v1097_v59 = vsub.f32 %v176_v35, %v111_v4  ;;  %v239_v7 = vsub.f32 %v175_v42, %v110_v26 }
  0xae   :  { %781 = vrsqrt.f32 %v1082_v51  ;;  %v574_v18 = vadd.f32 %v558_v21, %v542_v54  ;;  %v434_v39 = vrot.slane %v1057_v5, 1  ;;  %v223_v40 = vadd.f32 %v207_v50, %v175_v42  ;;  %v137_v52 = vpop.permute.xlu0 %136 }
  0xaf   :  { %v357_v22 = vsel %vm314_vm3, %v322_v56, %v222_v0  ;;  %v274_v25 = vsel %vm265_vm2, %v272_v58, %v273_v55  ;;  %v308_v27 = vsel %vm265_vm2, %v221_v44, %v272_v58  ;;  %v433_v28 = vrot.slane %v1059_v31, 1  ;;  %v139_v44 = vpop.permute.xlu1 %138 }
  0xb0   :  { %v323_v29 = vsel %vm314_vm3, %v321_v43, %v322_v56  ;;  %v495_v4 = vadd.f32 %v479_v1, %v421_v17  ;;  %v496_v30 = vadd.f32 %v480_v57, %v387_v63  ;;  %v388_v33 = vrot.slane %v239_v7, 7 }
  0xb1   :  { %v1106_v34 = vadd.f32 1e-06, %v573_v62  ;;  %v325_v36 = vrot.slane %v224_v6, 1  ;;  %v389_v26 = vrot.slane %v1097_v59, 7  ;;  %v437_v37 = vrot.slane %v1097_v59, 1 }
  0xb2   :  { %v275_v38 = vrot.slane %v223_v40, 7  ;;  %v324_v0 = vrot.slane %v223_v40, 1  ;;  %v422_v46 = vsel %vm265_vm2, %v239_v7, %v388_v33  ;;  %v436_v24 = vrot.slane %v239_v7, 1 }
  0xb3   :  { %v469_v31 = vsel %vm314_vm3, %v434_v39, %v1057_v5  ;;  %v435_v48 = vsel %vm314_vm3, %v433_v28, %v434_v39  ;;  %v528_v49 = vsub.f32 %v357_v22, %v274_v25  ;;  %v481_v50 = vmul.f32 2.0, %v239_v7  ;;  %v143_v25 = vpop.permute.xlu1 %142 }
  0xb4   :  { %v1114_v54 = vadd.f32 1e-06, %v574_v18  ;;  %v511_v21 = vadd.f32 %v495_v4, %v435_v48  ;;  %v512_v35 = vadd.f32 %v496_v30, %v469_v31  ;;  %v527_v42 = vsub.f32 %v323_v29, %v308_v27 }
  0xb5   :  { %783 = vrsqrt.f32 %v1106_v34  ;;  %v276_v55 = vrot.slane %v224_v6, 7  ;;  %v482_v56 = vmul.f32 2.0, %v1097_v59  ;;  %v497_v57 = vadd.f32 %v481_v50, %v422_v46 }
  0xb6   :  { %v309_v58 = vsel %vm265_vm2, %v223_v40, %v275_v38  ;;  %v326_v5 = vsel %vm314_vm3, %v324_v0, %v325_v36  ;;  %v390_v62 = vsel %vm265_vm2, %v388_v33, %v389_v26  ;;  %v438_v43 = vsel %vm314_vm3, %v436_v24, %v437_v37 }
  0xb7   :  { %v560_v63 = vmul.f32 %v528_v49, %v528_v49  ;;  %v513_v1 = vadd.f32 %v497_v57, %v438_v43  ;;  %v113_v17 = vsel %vm103_vm0, %v924_v8, %v1065_v41  ;;  %v112_v7 = vsel %vm103_vm0, %v926_v9, %v1070_v32  ;;  %v141_v41 = vpop.permute.xlu0 %140 }
  0xb8   :  { %v543_v18 = vmul.f32 %v511_v21, %v511_v21  ;;  %v544_v39 = vmul.f32 %v512_v35, %v512_v35  ;;  %v178_v40 = vsel %vm168_vm1, %v139_v44, %v924_v8  ;;  %v177_v22 = vsel %vm168_vm1, %v137_v52, %v926_v9  ;;  %v1150_v21 = vpop.permute.xlu1 %81 }
  0xb9   :  { %v358_v27 = vsel %vm314_vm3, %v325_v36, %v224_v6  ;;  %v277_v28 = vsel %vm265_vm2, %v275_v38, %v276_v55  ;;  %v498_v29 = vadd.f32 %v482_v56, %v390_v62  ;;  %v529_v4 = vsub.f32 %v326_v5, %v309_v58 }
  0xba   :  { %v210_v30 = vadd.f32 %v1007_v47, %v113_v17  ;;  %v209_v32 = vadd.f32 %v1012_v53, %v112_v7  ;;  %v1136_v33 = vsub.f32 %v178_v40, %v113_v17  ;;  %v241_v26 = vsub.f32 %v177_v22, %v112_v7 }
  0xbb   :  { %v1138_v0 = vpop.eup %781  ;;  %v559_v8 = vmul.f32 %v527_v42, %v527_v42  ;;  %v545_v46 = vmul.f32 %v513_v1, %v513_v1  ;;  %v115_v9 = vsel %vm103_vm0, %v932_v10, %v1093_v3  ;;  %v114_v6 = vsel %vm103_vm0, %v934_v11, %v76_v16  ;;  %v80_v42 = vpop.permute.xlu0 %79 }
  0xbc   :  { %v576_v36 = vadd.f32 %v560_v63, %v544_v39  ;;  %v470_v47 = vsel %vm314_vm3, %v437_v37, %v1097_v59  ;;  %v226_v38 = vadd.f32 %v210_v30, %v178_v40  ;;  %v225_v53 = vadd.f32 %v209_v32, %v177_v22 }
  0xbd   :  { %v575_v24 = vadd.f32 %v559_v8, %v543_v18  ;;  %v530_v44 = vsub.f32 %v358_v27, %v277_v28  ;;  %v561_v31 = vmul.f32 %v529_v4, %v529_v4  ;;  %v391_v48 = vrot.slane %v241_v26, 7  ;;  %v86_v28 = vpop.permute.xlu1 %85 }
  0xbe   :  { %v514_v49 = vadd.f32 %v498_v29, %v470_v47  ;;  %v212_v50 = vadd.f32 %v1017_v61, %v115_v9  ;;  %v211_v52 = vadd.f32 %v1028_v2, %v114_v6  ;;  %v392_v3 = vrot.slane %v1136_v33, 7 }
  0xbf   :  { %v577_v16 = vadd.f32 %v561_v31, %v545_v46  ;;  %v423_v35 = vsel %vm265_vm2, %v241_v26, %v391_v48  ;;  %v180_v59 = vsel %vm168_vm1, %v143_v25, %v932_v10  ;;  %v179_v37 = vsel %vm168_vm1, %v141_v41, %v934_v11  ;;  %v84_v32 = vpop.permute.xlu0 %83 }
  0xc0   :  { %v279_v55 = vrot.slane %v226_v38, 7  ;;  %v328_v56 = vrot.slane %v226_v38, 1  ;;  %v278_v57 = vrot.slane %v225_v53, 7  ;;  %v483_v61 = vmul.f32 2.0, %v241_v26 }
  0xc1   :  { %v440_v2 = vrot.slane %v1136_v33, 1  ;;  %v484_v58 = vmul.f32 2.0, %v1136_v33  ;;  %v327_v5 = vrot.slane %v225_v53, 1  ;;  %v439_v62 = vrot.slane %v241_v26, 1 }
  0xc2   :  { %v1159_v43 = vpop.eup %783  ;;  %v393_v63 = vsel %vm265_vm2, %v391_v48, %v392_v3  ;;  %v499_v1 = vadd.f32 %v483_v61, %v423_v35  ;;  %v228_v10 = vadd.f32 %v212_v50, %v180_v59  ;;  %v1162_v17 = vsub.f32 %v180_v59, %v115_v9 }
  0xc3   :  { %v1164_v11 = vadd.f32 1e-06, %v575_v24  ;;  %v546_v7 = vmul.f32 %v514_v49, %v514_v49  ;;  %v562_v18 = vmul.f32 %v530_v44, %v530_v44  ;;  %v227_v39 = vadd.f32 %v211_v52, %v179_v37 }
  0xc4   :  { %v1166_v40 = vadd.f32 1e-06, %v577_v16  ;;  %v359_v22 = vsel %vm314_vm3, %v328_v56, %v226_v38  ;;  %v280_v25 = vsel %vm265_vm2, %v278_v57, %v279_v55  ;;  %v243_v27 = vsub.f32 %v179_v37, %v114_v6 }
  0xc5   :  { %v310_v29 = vsel %vm265_vm2, %v225_v53, %v278_v57  ;;  %v329_v4 = vsel %vm314_vm3, %v327_v5, %v328_v56  ;;  %v441_v41 = vsel %vm314_vm3, %v439_v62, %v440_v2  ;;  %v500_v30 = vadd.f32 %v484_v58, %v393_v63  ;;  %v145_v57 = vpop.permute.xlu0 %144 }
  0xc6   :  { %v515_v26 = vadd.f32 %v499_v1, %v441_v41  ;;  %v331_v8 = vrot.slane %v228_v10, 1  ;;  %v443_v46 = vrot.slane %v1162_v17, 1  ;;  %v394_v9 = vrot.slane %v243_v27, 7 }
  0xc7   :  { %v281_v47 = vrot.slane %v227_v39, 7  ;;  %v330_v24 = vrot.slane %v227_v39, 1  ;;  %v442_v38 = vrot.slane %v243_v27, 1  ;;  %v485_v44 = vmul.f32 2.0, %v243_v27 }
  0xc8   :  { %v1174_v31 = vadd.f32 1e-06, %v576_v36  ;;  %v531_v6 = vsub.f32 %v329_v4, %v310_v29  ;;  %v532_v48 = vsub.f32 %v359_v22, %v280_v25  ;;  %v424_v53 = vsel %vm265_vm2, %v243_v27, %v394_v9  ;;  %v147_v36 = vpop.permute.xlu1 %146 }
  0xc9   :  { %785 = vrsqrt.f32 %v1164_v11  ;;  %v1178_v49 = vadd.f32 %v562_v18, %v546_v7  ;;  %v471_v50 = vsel %vm314_vm3, %v440_v2, %v1136_v33  ;;  %v501_v52 = vadd.f32 %v485_v44, %v424_v53 }
  0xca   :  { %787 = vrsqrt.f32 %v1166_v40  ;;  %v516_v3 = vadd.f32 %v500_v30, %v471_v50  ;;  %v282_v16 = vrot.slane %v228_v10, 7  ;;  %v395_v35 = vrot.slane %v1162_v17, 7 }
  0xcb   :  { %v547_v59 = vmul.f32 %v515_v26, %v515_v26  ;;  %v311_v37 = vsel %vm265_vm2, %v227_v39, %v281_v47  ;;  %v332_v55 = vsel %vm314_vm3, %v330_v24, %v331_v8  ;;  %v444_v56 = vsel %vm314_vm3, %v442_v38, %v443_v46 }
  0xcc   :  { %v563_v61 = vmul.f32 %v531_v6, %v531_v6  ;;  %v1187_v58 = vmul.f32 %v532_v48, %v532_v48  ;;  %v517_v33 = vadd.f32 %v501_v52, %v444_v56  ;;  %v117_v2 = vsel %vm103_vm0, %v948_v12, %v1150_v21  ;;  %v149_v48 = vpop.permute.xlu0 %148 }
  0xcd   :  { %v360_v5 = vsel %vm314_vm3, %v331_v8, %v228_v10  ;;  %v486_v62 = vmul.f32 2.0, %v1162_v17  ;;  %v116_v63 = vsel %vm103_vm0, %v950_v13, %v80_v42  ;;  %v182_v1 = vsel %vm168_vm1, %v147_v36, %v948_v12  ;;  %v151_v12 = vpop.permute.xlu1 %150 }
  0xce   :  { %v1198_v7 = vmul.f32 %v516_v3, %v516_v3  ;;  %v533_v18 = vsub.f32 %v332_v55, %v311_v37  ;;  %v246_v39 = vsub.f32 %v182_v1, %v117_v2  ;;  %v181_v22 = vsel %vm168_vm1, %v145_v57, %v950_v13 }
  0xcf   :  { %v579_v25 = vadd.f32 %v563_v61, %v547_v59  ;;  %v396_v21 = vsel %vm265_vm2, %v394_v9, %v395_v35  ;;  %v214_v10 = vadd.f32 %v1043_v60, %v117_v2  ;;  %v245_v27 = vsub.f32 %v181_v22, %v116_v63 }
  0xd0   :  { %v283_v29 = vsel %vm265_vm2, %v281_v47, %v282_v16  ;;  %v549_v4 = vmul.f32 %v517_v33, %v517_v33  ;;  %v213_v42 = vadd.f32 %v1068_v23, %v116_v63  ;;  %v398_v41 = vrot.slane %v246_v39, 7 }
  0xd1   :  { %v472_v30 = vsel %vm314_vm3, %v443_v46, %v1162_v17  ;;  %v119_v26 = vsel %vm103_vm0, %v956_v14, %v86_v28  ;;  %v118_v13 = vsel %vm103_vm0, %v958_v15, %v84_v32  ;;  %v230_v8 = vadd.f32 %v214_v10, %v182_v1 }
  0xd2   :  { %v502_v9 = vadd.f32 %v486_v62, %v396_v21  ;;  %v565_v60 = vmul.f32 %v533_v18, %v533_v18  ;;  %v229_v24 = vadd.f32 %v213_v42, %v181_v22  ;;  %v397_v38 = vrot.slane %v245_v27, 7 }
  0xd3   :  { %v1212_v47 = vadd.f32 1e-06, %v579_v25  ;;  %v534_v44 = vsub.f32 %v360_v5, %v283_v29  ;;  %v488_v23 = vmul.f32 2.0, %v246_v39  ;;  %v184_v6 = vsel %vm168_vm1, %v151_v12, %v956_v14 }
  0xd4   :  { %v581_v17 = vadd.f32 %v565_v60, %v549_v4  ;;  %v216_v46 = vadd.f32 %v1073_v45, %v119_v26  ;;  %v215_v28 = vadd.f32 %v1076_v19, %v118_v13  ;;  %v399_v32 = vsel %vm265_vm2, %v397_v38, %v398_v41 }
  0xd5   :  { %v285_v53 = vrot.slane %v230_v8, 7  ;;  %v334_v50 = vrot.slane %v230_v8, 1  ;;  %v446_v52 = vrot.slane %v246_v39, 1  ;;  %v487_v3 = vmul.f32 2.0, %v245_v27 }
  0xd6   :  { %v1219_v16 = vpop.eup %785  ;;  %v284_v35 = vrot.slane %v229_v24, 7  ;;  %v425_v36 = vsel %vm265_vm2, %v245_v27, %v397_v38  ;;  %v248_v59 = vsub.f32 %v184_v6, %v119_v26  ;;  %v183_v14 = vsel %vm168_vm1, %v149_v48, %v958_v15 }
  0xd7   :  { %v1224_v37 = vpop.eup %787  ;;  %v518_v45 = vadd.f32 %v502_v9, %v472_v30  ;;  %v333_v55 = vrot.slane %v229_v24, 1  ;;  %v445_v19 = vrot.slane %v245_v27, 1  ;;  %v504_v56 = vadd.f32 %v488_v23, %v399_v32 }
  0xd8   :  { %789 = vrsqrt.f32 %v1212_v47  ;;  %v1227_v57 = vadd.f32 1e-06, %v581_v17  ;;  %v232_v61 = vadd.f32 %v216_v46, %v184_v6  ;;  %v231_v33 = vadd.f32 %v215_v28, %v183_v14 }
  0xd9   :  { %v361_v2 = vsel %vm314_vm3, %v334_v50, %v230_v8  ;;  %v503_v5 = vadd.f32 %v487_v3, %v425_v36  ;;  %v401_v62 = vrot.slane %v248_v59, 7  ;;  %v247_v63 = vsub.f32 %v183_v14, %v118_v13 }
  0xda   :  { %v473_v1 = vsel %vm314_vm3, %v446_v52, %v246_v39  ;;  %v286_v15 = vsel %vm265_vm2, %v284_v35, %v285_v53  ;;  %v312_v18 = vsel %vm265_vm2, %v229_v24, %v284_v35  ;;  %v490_v22 = vmul.f32 2.0, %v248_v59 }
  0xdb   :  { %v335_v25 = vsel %vm314_vm3, %v333_v55, %v334_v50  ;;  %v447_v21 = vsel %vm314_vm3, %v445_v19, %v446_v52  ;;  %v520_v10 = vadd.f32 %v504_v56, %v473_v1  ;;  %v400_v27 = vrot.slane %v247_v63, 7 }
  0xdc   :  { %v288_v29 = vrot.slane %v232_v61, 7  ;;  %v337_v4 = vrot.slane %v232_v61, 1  ;;  %v449_v42 = vrot.slane %v248_v59, 1  ;;  %v287_v41 = vrot.slane %v231_v33, 7 }
  0xdd   :  { %v519_v12 = vadd.f32 %v503_v5, %v447_v21  ;;  %v536_v30 = vsub.f32 %v361_v2, %v286_v15  ;;  %v402_v26 = vsel %vm265_vm2, %v400_v27, %v401_v62  ;;  %v426_v39 = vsel %vm265_vm2, %v247_v63, %v400_v27 }
  0xde   :  { %v336_v13 = vrot.slane %v231_v33, 1  ;;  %v448_v8 = vrot.slane %v247_v63, 1  ;;  %v489_v9 = vmul.f32 2.0, %v247_v63  ;;  %v506_v60 = vadd.f32 %v490_v22, %v402_v26 }
  0xdf   :  { %v550_v24 = vmul.f32 %v518_v45, %v518_v45  ;;  %v566_v38 = vmul.f32 %v534_v44, %v534_v44  ;;  %v535_v23 = vsub.f32 %v335_v25, %v312_v18  ;;  %v552_v6 = vmul.f32 %v520_v10, %v520_v10 }
  0xe0   :  { %v362_v48 = vsel %vm314_vm3, %v337_v4, %v232_v61  ;;  %v474_v17 = vsel %vm314_vm3, %v449_v42, %v248_v59  ;;  %v289_v46 = vsel %vm265_vm2, %v287_v41, %v288_v29  ;;  %v505_v28 = vadd.f32 %v489_v9, %v426_v39 }
  0xe1   :  { %791 = vrsqrt.f32 %v1227_v57  ;;  %v551_v32 = vmul.f32 %v519_v12, %v519_v12  ;;  %v568_v53 = vmul.f32 %v536_v30, %v536_v30  ;;  %v522_v50 = vadd.f32 %v506_v60, %v474_v17 }
  0xe2   :  { %v313_v52 = vsel %vm265_vm2, %v231_v33, %v287_v41  ;;  %v338_v3 = vsel %vm314_vm3, %v336_v13, %v337_v4  ;;  %v450_v44 = vsel %vm314_vm3, %v448_v8, %v449_v42  ;;  %793 = vrsqrt.f32 %v1084_v20 }
  0xe3   :  { %v580_v35 = vadd.f32 %v1187_v58, %v1198_v7  ;;  %v582_v36 = vadd.f32 %v566_v38, %v550_v24  ;;  %v521_v59 = vadd.f32 %v505_v28, %v450_v44  ;;  %v538_v14 = vsub.f32 %v362_v48, %v289_v46 }
  0xe4   :  { %v567_v45 = vmul.f32 %v535_v23, %v535_v23  ;;  %v584_v55 = vadd.f32 %v568_v53, %v552_v6  ;;  %v604_v19 = vmul.f32 %v1138_v0, %v1082_v51  ;;  %795 = vrsqrt.f32 %v1114_v54 }
  0xe5   :  { %v790_v56 = vpop.eup %789  ;;  %v537_v61 = vsub.f32 %v338_v3, %v313_v52  ;;  %v554_v33 = vmul.f32 %v522_v50, %v522_v50  ;;  %v1251_v2 = vadd.f32 1e-06, %v1178_v49  ;;  %vm605_vm4 = vcmp.eq.f32.partialorder %v1082_v51, inf }
  0xe6   :  { %v583_v5 = vadd.f32 %v567_v45, %v551_v32  ;;  %v553_v58 = vmul.f32 %v521_v59, %v521_v59  ;;  %v570_v7 = vmul.f32 %v538_v14, %v538_v14  ;;  %v618_v62 = vmul.f32 %v1159_v43, %v1106_v34 }
  0xe7   :  { %797 = vrsqrt.f32 %v1174_v31  ;;  %v1257_v63 = vadd.f32 1e-06, %v580_v35  ;;  %v1259_v0 = vadd.f32 1e-06, %v582_v36  ;;  %v1261_v1 = vadd.f32 1e-06, %v584_v55 }
  0xe8   :  { %v606_v15 = vsel %vm605_vm4, %v1082_v51, %v604_v19  ;;  %v569_v49 = vmul.f32 %v537_v61, %v537_v61  ;;  %v586_v18 = vadd.f32 %v570_v7, %v554_v33  ;;  %v608_v22 = vand.u32 2147483648, %v1082_v51 }
  0xe9   :  { %v632_v25 = vmul.f32 %v1219_v16, %v1164_v11  ;;  %v1267_v21 = vadd.f32 1e-06, %v583_v5  ;;  %vm607_vm5 = vcmp.eq.f32.partialorder %v1082_v51, 0.0  ;;  %vm619_vm6 = vcmp.eq.f32.partialorder %v1106_v34, inf }
  0xea   :  { %799 = vrsqrt.f32 %v1251_v2  ;;  %v585_v43 = vadd.f32 %v569_v49, %v553_v58  ;;  %v1272_v10 = vsel %vm607_vm5, %v608_v22, %v606_v15  ;;  %v620_v27 = vsel %vm619_vm6, %v1106_v34, %v618_v62 }
  0xeb   :  { %v646_v29 = vmul.f32 %v1224_v37, %v1166_v40  ;;  %v615_v4 = vand.u32 2147483648, %v1084_v20  ;;  %vm621_vm7 = vcmp.eq.f32.partialorder %v1106_v34, 0.0  ;;  %v622_v16 = vand.u32 2147483648, %v1106_v34 }
  0xec   :  { %vm633_vm8 = vcmp.eq.f32.partialorder %v1164_v11, inf  ;;  %v1281_v51 = vadd.f32 1e-06, %v586_v18  ;;  %vm612_vm9 = vcmp.eq.f32.partialorder %v1084_v20, inf  ;;  %v629_v42 = vand.u32 2147483648, %v1114_v54 }
  0xed   :  { %v634_v41 = vsel %vm633_vm8, %v1164_v11, %v632_v25  ;;  %801 = vrsqrt.f32 %v1257_v63  ;;  %v1287_v37 = vsel %vm621_vm7, %v622_v16, %v620_v27  ;;  %vm635_vm10 = vcmp.eq.f32.partialorder %v1164_v11, 0.0 }
  0xee   :  { %v792_v12 = vpop.eup %791  ;;  %v636_v30 = vand.u32 2147483648, %v1164_v11  ;;  %vm647_vm11 = vcmp.eq.f32.partialorder %v1166_v40, inf  ;;  %v1292_v26 = vadd.f32 1e-06, %v585_v43  ;;  %vm626_vm12 = vcmp.eq.f32.partialorder %v1114_v54, inf }
  0xef   :  { %v794_v34 = vpop.eup %793  ;;  %v648_v39 = vsel %vm647_vm11, %v1166_v40, %v646_v29  ;;  %v660_v13 = vmul.f32 %v790_v56, %v1212_v47  ;;  %803 = vrsqrt.f32 %v1259_v0  ;;  %vm614_vm13 = vcmp.eq.f32.partialorder %v1084_v20, 0.0 }
  0xf0   :  { %v637_v8 = vsel %vm635_vm10, %v636_v30, %v634_v41  ;;  %vm640_vm14 = vcmp.eq.f32.partialorder %v1174_v31, inf  ;;  %v643_v11 = vand.u32 2147483648, %v1174_v31  ;;  %v650_v9 = vand.u32 2147483648, %v1166_v40 }
  0xf1   :  { %v796_v60 = vpop.eup %795  ;;  %vm642_vm15 = vcmp.eq.f32.partialorder %v1174_v31, 0.0  ;;  %vm649_vm0 = vcmp.eq.f32.partialorder %v1166_v40, 0.0  ;;  %vm654_vm1 = vcmp.eq.f32.partialorder %v1251_v2, inf  ;;  %v674_v24 = vmul.f32 %v792_v12, %v1227_v57 }
  0xf2   :  { %805 = vrsqrt.f32 %v1267_v21  ;;  %vm715_vm2 = vcmask 130048   ;;  %v611_v38 = vmul.f32 %v794_v34, %v1084_v20  ;;  %vm628_vm3 = vcmp.eq.f32.partialorder %v1114_v54, 0.0 }
  0xf3   :  { %v651_v23 = vsel %vm649_vm0, %v650_v9, %v648_v39  ;;  %v657_v6 = vand.u32 2147483648, %v1251_v2  ;;  %vm661_vm4 = vcmp.eq.f32.partialorder %v1212_v47, inf  ;;  %vm663_vm5 = vcmp.eq.f32.partialorder %v1212_v47, 0.0 }
  0xf4   :  { %v662_v48 = vsel %vm661_vm4, %v1212_v47, %v660_v13  ;;  %v664_v40 = vand.u32 2147483648, %v1212_v47  ;;  %807 = vrsqrt.f32 %v1261_v1  ;;  %v798_v17 = vpop.eup %797  ;;  %v625_v46 = vmul.f32 %v796_v60, %v1114_v54 }
  0xf5   :  { %vm656_vm6 = vcmp.eq.f32.partialorder %v1251_v2, 0.0  ;;  %vm668_vm7 = vcmp.eq.f32.partialorder %v1257_v63, inf  ;;  %vm675_vm8 = vcmp.eq.f32.partialorder %v1227_v57, inf  ;;  %809 = vrsqrt.f32 %v1292_v26 }
  0xf6   :  { %v639_v28 = vmul.f32 %v798_v17, %v1174_v31  ;;  %vm670_vm10 = vcmp.eq.f32.partialorder %v1257_v63, 0.0  ;;  %v676_v32 = vsel %vm675_vm8, %v1227_v57, %v674_v24  ;;  %811 = vrsqrt.f32 %v1281_v51 }
  0xf7   :  { %v613_v47 = vsel %vm612_vm9, %v1084_v20, %v611_v38  ;;  %v665_v53 = vsel %vm663_vm5, %v664_v40, %v662_v48  ;;  %v671_v50 = vand.u32 2147483648, %v1257_v63  ;;  %v678_v52 = vand.u32 2147483648, %v1227_v57  ;;  %v800_v3 = vpop.eup %799 }
  0xf8   :  { %v641_v44 = vsel %vm640_vm14, %v1174_v31, %v639_v28  ;;  %vm677_vm11 = vcmp.eq.f32.partialorder %v1227_v57, 0.0  ;;  %vm682_vm0 = vcmp.eq.f32.partialorder %v1259_v0, inf  ;;  %vm684_vm4 = vcmp.eq.f32.partialorder %v1259_v0, 0.0 }
  0xf9   :  { %v627_v35 = vsel %vm626_vm12, %v1114_v54, %v625_v46  ;;  %v653_v36 = vmul.f32 %v800_v3, %v1251_v2  ;;  %v679_v59 = vsel %vm677_vm11, %v678_v52, %v676_v32  ;;  %v685_v14 = vand.u32 2147483648, %v1259_v0 }
  0xfa   :  { %v616_v45 = vsel %vm614_vm13, %v615_v4, %v613_v47  ;;  %vm689_vm9 = vcmp.eq.f32.partialorder %v1267_v21, inf  ;;  %vm691_vm14 = vcmp.eq.f32.partialorder %v1267_v21, 0.0  ;;  %v692_v57 = vand.u32 2147483648, %v1267_v21  ;;  %v802_v55 = vpop.eup %801 }
  0xfb   :  { %v644_v19 = vsel %vm642_vm15, %v643_v11, %v641_v44  ;;  %v655_v56 = vsel %vm654_vm1, %v1251_v2, %v653_v36  ;;  %vm696_vm12 = vcmp.eq.f32.partialorder %v1261_v1, inf  ;;  %v699_v61 = vand.u32 2147483648, %v1261_v1 }
  0xfc   :  { %v630_v20 = vsel %vm628_vm3, %v629_v42, %v627_v35  ;;  %v667_v33 = vmul.f32 %v802_v55, %v1257_v63  ;;  %vm698_vm13 = vcmp.eq.f32.partialorder %v1261_v1, 0.0  ;;  %vm703_vm5 = vcmp.eq.f32.partialorder %v1292_v26, inf  ;;  %v804_v5 = vpop.eup %803 }
  0xfd   :  { %v706_v31 = vand.u32 2147483648, %v1292_v26  ;;  %vm705_vm15 = vcmp.eq.f32.partialorder %v1292_v26, 0.0  ;;  %vm710_vm1 = vcmp.eq.f32.partialorder %v1281_v51, inf  ;;  %v713_v58 = vand.u32 2147483648, %v1281_v51 }
  0xfe   :  { %v716_v7 = vsel %vm715_vm2, %v1272_v10, -inf  ;;  %v720_v54 = vsel %vm715_vm2, %v637_v8, -inf  ;;  %v724_v62 = vsel %vm715_vm2, %v651_v23, -inf  ;;  %v658_v15 = vsel %vm656_vm6, %v657_v6, %v655_v56 }
  0xff   :  { %v669_v49 = vsel %vm668_vm7, %v1257_v63, %v667_v33  ;;  %v681_v18 = vmul.f32 %v804_v5, %v1259_v0  ;;  %vm712_vm3 = vcmp.eq.f32.partialorder %v1281_v51, 0.0  ;;  %v722_v22 = vsel %vm715_vm2, %v644_v19, -inf  ;;  %v806_v25 = vpop.eup %805 }
 0x100   :  { %v672_v43 = vsel %vm670_vm10, %v671_v50, %v669_v49  ;;  %v717_v10 = vsel %vm715_vm2, %v616_v45, -inf  ;;  %v718_v2 = vsel %vm715_vm2, %v1287_v37, -inf  ;;  %v719_v27 = vsel %vm715_vm2, %v630_v20, -inf }
 0x101   :  { %v683_v29 = vsel %vm682_vm0, %v1259_v0, %v681_v18  ;;  %v688_v4 = vmul.f32 %v806_v25, %v1267_v21  ;;  %v721_v16 = vmax.f32 %v716_v7, %v720_v54  ;;  %v728_v42 = vsel %vm715_vm2, %v665_v53, -inf  ;;  %v808_v41 = vpop.eup %807 }
 0x102   :  { %v686_v63 = vsel %vm684_vm4, %v685_v14, %v683_v29  ;;  %v723_v12 = vmax.f32 %v717_v10, %v722_v22  ;;  %v725_v30 = vmax.f32 %v718_v2, %v724_v62  ;;  %v726_v34 = vsel %vm715_vm2, %v658_v15, -inf  ;;  %v810_v37 = vpop.eup %809 }
 0x103   :  { %v690_v39 = vsel %vm689_vm9, %v1267_v21, %v688_v4  ;;  %v695_v13 = vmul.f32 %v808_v41, %v1261_v1  ;;  %v730_v8 = vsel %vm715_vm2, %v672_v43, -inf  ;;  %v732_v11 = vsel %vm715_vm2, %v679_v59, -inf  ;;  %v812_v9 = vpop.eup %811 }
 0x104   :  { %v693_v0 = vsel %vm691_vm14, %v692_v57, %v690_v39  ;;  %v702_v60 = vmul.f32 %v810_v37, %v1292_v26  ;;  %v729_v24 = vmax.f32 %v721_v16, %v728_v42  ;;  %v734_v38 = vsel %vm715_vm2, %v686_v63, -inf }
 0x105   :  { %v697_v23 = vsel %vm696_vm12, %v1261_v1, %v695_v13  ;;  %v709_v6 = vmul.f32 %v812_v9, %v1281_v51  ;;  %v727_v48 = vmax.f32 %v719_v27, %v726_v34  ;;  %v736_v40 = vsel %vm715_vm2, %v693_v0, -inf }
 0x106   :  { %v700_v17 = vsel %vm698_vm13, %v699_v61, %v697_v23  ;;  %v704_v21 = vsel %vm703_vm5, %v1292_v26, %v702_v60  ;;  %v731_v46 = vmax.f32 %v723_v12, %v730_v8  ;;  %v733_v28 = vmax.f32 %v725_v30, %v732_v11 }
 0x107   :  { %v707_v32 = vsel %vm705_vm15, %v706_v31, %v704_v21  ;;  %v711_v47 = vsel %vm710_vm1, %v1281_v51, %v709_v6  ;;  %v735_v53 = vmax.f32 %v727_v48, %v734_v38  ;;  %v738_v50 = vsel %vm715_vm2, %v700_v17, -inf }
 0x108   :  { %v714_v1 = vsel %vm712_vm3, %v713_v58, %v711_v47  ;;  %v737_v52 = vmax.f32 %v729_v24, %v736_v40  ;;  %v739_v3 = vmax.f32 %v731_v46, %v738_v50  ;;  %v740_v44 = vsel %vm715_vm2, %v707_v32, -inf }
 0x109   :  { %v741_v35 = vmax.f32 %v733_v28, %v740_v44  ;;  %v742_v36 = vsel %vm715_vm2, %v714_v1, -inf }
 0x10a   :  { %v743_v59 = vmax.f32 %v735_v53, %v742_v36  ;;  %v744_v26 = vmax.f32 %v737_v52, %v739_v3 }
 0x10c   :  { %v745_v14 = vmax.f32 %v741_v35, %v743_v59 }
 0x10e   :  { %v746_v45 = vmax.f32 %v744_v26, %v745_v14 }
 0x110   :  { %747 = vmax.xlane.f32.xlu0 %v746_v45 }
 0x199   :  { %v748_v57 = vpop.xlane.xlu0 %747 }
 0x19a   :  { %v749_v55 = vrot.slane %v748_v57, 4 }
 0x19c   :  { %v750_v19 = vmax.f32 %v748_v57, %v749_v55 }
 0x19e   :  { %v751_v56 = vrot.slane %v750_v19, 2 }
 0x1a0   :  { %v752_v61 = vmax.f32 %v750_v19, %v751_v56 }
 0x1a2   :  { %v753_v20 = vrot.slane %v752_v61, 1 }
 0x1a4   :  { %v754_v51 = vmax.f32 %v752_v61, %v753_v20 }
 0x1a6   :  { %773 = vpush %v754_v51 }
 0x1d7   :  { %s774_s16 = spop %773 }
 0x1d8   :  { %v756_v33 = vstv %s774_s16 }
 0x1d9   :  { %757 = vst [vmem:[#allocation5] sm:$0xff] %v756_v33 }
 0x1da   :  { %844 = shalt.err (!%p841_p9)
}
 0x1db   :  { %767 = dma.vmem_to_hbm [thread:$0]  %s765_s15, 128, %s1425_s1, [#allocation4]  }
 0x1dc   :  { %855 = dma.done.wait [#allocation4], 128  }
 0x1dd   :  { %856 = vsyncadd [#allocation4], 4294967168 }
 0x1de   :  { %771 = vsyncpa [#allocation3], 1 }
 0x1df   :  { %772 = vsyncpa [#allocation4], 1 }

</bundles_post_ra>
